<compile_context>
chip_gen: v7x
topology: tpu7x:2x2x1
jax: 0.10.0
libtpu: 0.0.40
codegen_flags: <defaults>
</compile_context>

<pallas_src>
import jax
import jax.numpy as jnp
from jax import lax
from jax.experimental import pallas as pl
from jax.experimental.pallas import tpu as pltpu


def _round_up(v, m):
    return (v + m - 1) // m * m


def _default_vmem_limit_bytes():
    # v5e/v6e: 128 MiB physical -> ~112 MiB request; v7x: 64 MiB/TC -> ~56 MiB.
    try:
        cap = pltpu.get_tpu_info().vmem_capacity_bytes
        return int(min(cap * 7 // 8, 112 * 1024 * 1024))
    except Exception:
        return 48 * 1024 * 1024  # conservative, safe on all generations


def student_forward_with_loss(x, w1, b1, w2, b2, y, *, tm=256, vmem_limit_bytes=None):
    """x: (M, H) tokens; y: (M, H) stored target activations (full precision).
    Returns (a: (M, H) bf16 student output, loss: scalar f32 l1_cos)."""
    M, H = x.shape
    R = w1.shape[1]

    # ---- host-side weight prep (once, tiny tensors) -------------------------
    # Zero-pad the low-rank dim R to a multiple of 128 (lane width; N dim of
    # matmul-1 / K dim of matmul-2). Exact: padded columns/rows are zero.
    Rp = _round_up(R, 128)
    if Rp != R:
        w1 = jnp.pad(w1, ((0, 0), (0, Rp - R)))
        w2 = jnp.pad(w2, ((0, Rp - R), (0, 0)))
        b1 = jnp.pad(b1, ((0, Rp - R),))
    w1_bf = w1.astype(jnp.bfloat16)
    w2_bf = w2.astype(jnp.bfloat16)
    b1_2d = b1.reshape(1, Rp).astype(jnp.float32)
    b2_2d = b2.reshape(1, H).astype(jnp.float32)

    # No host-side padding of x / y: let the last block be partial.
    tm = max(8, min(tm, _round_up(M, 8)))  # keep sublane-aligned, don't overshoot M
    num_tiles = pl.cdiv(M, tm)

    if vmem_limit_bytes is None:
        vmem_limit_bytes = _default_vmem_limit_bytes()

    def kernel(x_ref, w1_ref, b1_ref, w2_ref, b2_ref, y_ref, a_ref, loss_ref):
        # Student forward: a = (x @ W1 + b1) @ W2 + b2.
        # bf16 MXU operands, f32 accumulation; x cast under the DMA (no extra pass).
        x_bf = x_ref[...].astype(jnp.bfloat16)                            # (tm, H)
        h = jnp.dot(x_bf, w1_ref[...],
                    preferred_element_type=jnp.float32) + b1_ref[...]     # (tm, Rp)
        a = jnp.dot(h.astype(jnp.bfloat16), w2_ref[...],
                    preferred_element_type=jnp.float32) + b2_ref[...]     # (tm, H) f32
        a_ref[...] = a.astype(a_ref.dtype)          # single cast, bf16 writeback

        # l1_cos loss vs. full-precision stored targets y (matches torch).
        y = y_ref[...].astype(jnp.float32)
        d = a - y
        l1 = jnp.mean(jnp.abs(d), axis=-1, keepdims=True)                 # (tm, 1)
        dot = jnp.sum(a * y, axis=-1, keepdims=True)
        sum_aa = jnp.sum(a * a, axis=-1, keepdims=True)
        sum_yy = jnp.sum(y * y, axis=-1, keepdims=True)
        eps = jnp.float32(1e-8)
        # torch cosine_similarity clamps each norm separately:
        #   max(||v||, eps) == sqrt(max(||v||^2, eps^2)) -> one EUP rsqrt per norm.
        inv_na = lax.rsqrt(jnp.maximum(sum_aa, eps * eps))
        inv_ny = lax.rsqrt(jnp.maximum(sum_yy, eps * eps))
        cos = dot * inv_na * inv_ny
        log_sig_cos = -jnp.log1p(jnp.exp(-cos))     # log(sigmoid(cos)), stable
        per_row = l1 - log_sig_cos                                        # (tm, 1)

        # Mask the ragged tail of the (partial) last block; M is a static int
        # closed over at trace time. jnp.where keeps NaNs in dead rows from
        # propagating. Reduce to one scalar per tile in SMEM.
        row = pl.program_id(0) * tm + lax.broadcasted_iota(jnp.int32, per_row.shape, 0)
        per_row = jnp.where(row < M, per_row, jnp.float32(0.0))
        loss_ref[0, 0] = jnp.sum(per_row)

    resident = dict(pipeline_mode=pl.Buffered(1))   # constant index_map: 1 buffer

    a, per_tile = pl.pallas_call(
        kernel,
        out_shape=(
            jax.ShapeDtypeStruct((M, H), jnp.bfloat16),
            jax.ShapeDtypeStruct((num_tiles, 1), jnp.float32),
        ),
        grid_spec=pltpu.PrefetchScalarGridSpec(
            num_scalar_prefetch=0,
            grid=(num_tiles,),
            in_specs=[
                pl.BlockSpec((tm, H), lambda i: (i, 0)),                  # x tile
                pl.BlockSpec((H, Rp), lambda i: (0, 0), **resident),      # W1 resident
                pl.BlockSpec((1, Rp), lambda i: (0, 0)),                  # b1
                pl.BlockSpec((Rp, H), lambda i: (0, 0), **resident),      # W2 resident
                pl.BlockSpec((1, H), lambda i: (0, 0)),                   # b2
                pl.BlockSpec((tm, H), lambda i: (i, 0)),                  # y tile
            ],
            out_specs=[
                pl.BlockSpec((tm, H), lambda i: (i, 0)),                  # a (bf16)
                pl.BlockSpec((1, 1), lambda i: (i, 0),
                             memory_space=pltpu.MemorySpace.SMEM),        # per-tile loss
            ],
        ),
        compiler_params=pltpu.CompilerParams(
            dimension_semantics=("parallel",),
            vmem_limit_bytes=vmem_limit_bytes,
        ),
    )(x, w1_bf, b1_2d, w2_bf, b2_2d, y)

    loss = jnp.sum(per_tile) / jnp.float32(M)   # glue: final mean over real rows
    return a, loss


if __name__ == "__main__":
    # Small shapes: batch=2, seq=8, hidden=32, low-rank=16
    B, S, H, R = 2, 8, 32, 16
    M = B * S

    key = jax.random.PRNGKey(0)
    kx, ky, kw1, kw2, kb1, kb2 = jax.random.split(key, 6)

    x = jax.random.normal(kx, (B, S, H), dtype=jnp.float32)
    # Stored activations (targets of the local distillation loss)
    y_act = jax.random.normal(ky, (B, S, H), dtype=jnp.float32)

    # Deterministic synthetic student parameters (low-rank linear pair)
    w1 = jax.random.normal(kw1, (H, R), dtype=jnp.float32) * 0.1
    b1 = jax.random.normal(kb1, (R,), dtype=jnp.float32) * 0.01
    w2 = jax.random.normal(kw2, (R, H), dtype=jnp.float32) * 0.1
    b2 = jax.random.normal(kb2, (H,), dtype=jnp.float32) * 0.01

    x2d = x.reshape(M, H)
    y2d = y_act.reshape(M, H)

    a2d, loss = student_forward_with_loss(x2d, w1, b1, w2, b2, y2d, tm=256)
    a = a2d.reshape(B, S, H)

    jax.block_until_ready(a)
    jax.block_until_ready(loss)

    # Reference check: same bf16 MXU operand casting; loss against f32 targets.
    xb = x2d.astype(jnp.bfloat16)
    h_ref = jnp.dot(xb, w1.astype(jnp.bfloat16),
                    preferred_element_type=jnp.float32) + b1
    a_ref = jnp.dot(h_ref.astype(jnp.bfloat16), w2.astype(jnp.bfloat16),
                    preferred_element_type=jnp.float32) + b2
    l1_ref = jnp.mean(jnp.abs(a_ref - y2d), axis=-1)
    eps = 1e-8
    cos_ref = (jnp.sum(a_ref * y2d, -1)
               / (jnp.maximum(jnp.linalg.norm(a_ref, axis=-1), eps)
                  * jnp.maximum(jnp.linalg.norm(y2d, axis=-1), eps)))
    loss_ref = jnp.mean(l1_ref + jnp.log1p(jnp.exp(-cos_ref)))

    assert a.shape == (B, S, H)
    assert a.dtype == jnp.bfloat16
    assert loss.shape == ()
    a_f32 = a2d.astype(jnp.float32)
    assert bool(jnp.all(jnp.isfinite(a_f32)))
    assert bool(jnp.allclose(a_f32, a_ref, rtol=2e-2, atol=2e-2))
    assert bool(jnp.abs(loss - loss_ref) < 2e-2)
    print("KERNEL_OK")
</pallas_src>

<mosaic_0001>
module attributes {stable_mosaic.version = 11 : i64} {
  func.func @kernel(%arg0: i32, %arg1: memref<16x32xf32, #tpu.memory_space<vmem>>, %arg2: memref<32x128xbf16, #tpu.memory_space<vmem>>, %arg3: memref<1x128xf32, #tpu.memory_space<vmem>>, %arg4: memref<128x32xbf16, #tpu.memory_space<vmem>>, %arg5: memref<1x32xf32, #tpu.memory_space<vmem>>, %arg6: memref<16x32xf32, #tpu.memory_space<vmem>>, %arg7: memref<16x32xbf16, #tpu.memory_space<vmem>>, %arg8: memref<1x1xf32, #tpu.memory_space<smem>>) attributes {dimension_semantics = [#tpu.dimension_semantics<parallel>], iteration_bounds = array<i64: 1>, scalar_prefetch = 0 : i64, scratch_operands = 0 : i64, tpu.core_type = #tpu.core_type<tc>, window_params = [{transform_indices = @transform_0, window_bounds = array<i64: 16, 32>}, {pipeline_mode = #tpu.pipeline_mode<synchronous>, transform_indices = @transform_1, window_bounds = array<i64: 32, 128>}, {pipeline_mode = #tpu.pipeline_mode<synchronous>, transform_indices = @transform_2, window_bounds = array<i64: 1, 128>}, {pipeline_mode = #tpu.pipeline_mode<synchronous>, transform_indices = @transform_3, window_bounds = array<i64: 128, 32>}, {pipeline_mode = #tpu.pipeline_mode<synchronous>, transform_indices = @transform_4, window_bounds = array<i64: 1, 32>}, {transform_indices = @transform_5, window_bounds = array<i64: 16, 32>}, {transform_indices = @transform_6, window_bounds = array<i64: 16, 32>}, {transform_indices = @transform_7, window_bounds = array<i64: 1, 1>}]} {
    %c0 = arith.constant 0 : index
    %c0_0 = arith.constant 0 : index
    %0 = vector.load %arg1[%c0, %c0_0] : memref<16x32xf32, #tpu.memory_space<vmem>>, vector<16x32xf32>
    %1 = arith.truncf %0 : vector<16x32xf32> to vector<16x32xbf16>
    %c0_1 = arith.constant 0 : index
    %c0_2 = arith.constant 0 : index
    %2 = vector.load %arg2[%c0_1, %c0_2] : memref<32x128xbf16, #tpu.memory_space<vmem>>, vector<32x128xbf16>
    %cst = arith.constant dense<0.000000e+00> : vector<16x128xf32>
    %3 = tpu.matmul %1, %2, %cst {dimension_numbers = #tpu.dot_dimension_numbers<[1], [0], [0], [1], [0, 0, 1, 1], [], []>} : vector<16x32xbf16>, vector<32x128xbf16>, vector<16x128xf32> -> vector<16x128xf32>
    %c0_3 = arith.constant 0 : index
    %c0_4 = arith.constant 0 : index
    %4 = vector.load %arg3[%c0_3, %c0_4] : memref<1x128xf32, #tpu.memory_space<vmem>>, vector<1x128xf32>
    %5 = vector.broadcast %4 : vector<1x128xf32> to vector<16x128xf32>
    %6 = arith.addf %3, %5 : vector<16x128xf32>
    %7 = arith.truncf %6 : vector<16x128xf32> to vector<16x128xbf16>
    %c0_5 = arith.constant 0 : index
    %c0_6 = arith.constant 0 : index
    %8 = vector.load %arg4[%c0_5, %c0_6] : memref<128x32xbf16, #tpu.memory_space<vmem>>, vector<128x32xbf16>
    %cst_7 = arith.constant dense<0.000000e+00> : vector<16x32xf32>
    %9 = tpu.matmul %7, %8, %cst_7 {dimension_numbers = #tpu.dot_dimension_numbers<[1], [0], [0], [1], [0, 0, 1, 1], [], []>} : vector<16x128xbf16>, vector<128x32xbf16>, vector<16x32xf32> -> vector<16x32xf32>
    %c0_8 = arith.constant 0 : index
    %c0_9 = arith.constant 0 : index
    %10 = vector.load %arg5[%c0_8, %c0_9] : memref<1x32xf32, #tpu.memory_space<vmem>>, vector<1x32xf32>
    %11 = vector.broadcast %10 : vector<1x32xf32> to vector<16x32xf32>
    %12 = arith.addf %9, %11 : vector<16x32xf32>
    %13 = arith.truncf %12 : vector<16x32xf32> to vector<16x32xbf16>
    %c0_10 = arith.constant 0 : index
    %c0_11 = arith.constant 0 : index
    %14 = vector.load %arg7[%c0_10, %c0_11] : memref<16x32xbf16, #tpu.memory_space<vmem>>, vector<16x32xbf16>
    tpu.vector_store %arg7[%c0_10, %c0_11], %13 {strides = array<i32>} : memref<16x32xbf16, #tpu.memory_space<vmem>>, vector<16x32xbf16>,
    %c0_12 = arith.constant 0 : index
    %c0_13 = arith.constant 0 : index
    %15 = vector.load %arg6[%c0_12, %c0_13] : memref<16x32xf32, #tpu.memory_space<vmem>>, vector<16x32xf32>
    %16 = arith.subf %12, %15 : vector<16x32xf32>
    %17 = math.absf %16 : vector<16x32xf32>
    %cst_14 = arith.constant dense<0.000000e+00> : vector<16xf32>
    %18 = vector.multi_reduction <add>, %17, %cst_14 [1] : vector<16x32xf32> to vector<16xf32>
    %19 = vector.shape_cast %18 : vector<16xf32> to vector<16x1xf32>
    %cst_15 = arith.constant 3.200000e+01 : f32
    %20 = vector.broadcast %cst_15 : f32 to vector<16x1xf32>
    %21 = arith.divf %19, %20 : vector<16x1xf32>
    %22 = arith.mulf %12, %15 : vector<16x32xf32>
    %cst_16 = arith.constant dense<0.000000e+00> : vector<16xf32>
    %23 = vector.multi_reduction <add>, %22, %cst_16 [1] : vector<16x32xf32> to vector<16xf32>
    %24 = vector.shape_cast %23 : vector<16xf32> to vector<16x1xf32>
    %25 = arith.mulf %12, %12 : vector<16x32xf32>
    %cst_17 = arith.constant dense<0.000000e+00> : vector<16xf32>
    %26 = vector.multi_reduction <add>, %25, %cst_17 [1] : vector<16x32xf32> to vector<16xf32>
    %27 = vector.shape_cast %26 : vector<16xf32> to vector<16x1xf32>
    %28 = arith.mulf %15, %15 : vector<16x32xf32>
    %cst_18 = arith.constant dense<0.000000e+00> : vector<16xf32>
    %29 = vector.multi_reduction <add>, %28, %cst_18 [1] : vector<16x32xf32> to vector<16xf32>
    %30 = vector.shape_cast %29 : vector<16xf32> to vector<16x1xf32>
    %cst_19 = arith.constant 9.99999993E-9 : f32
    %cst_20 = arith.constant 9.99999993E-9 : f32
    %31 = arith.mulf %cst_19, %cst_20 : f32
    %32 = vector.broadcast %31 : f32 to vector<16x1xf32>
    %33 = arith.maximumf %27, %32 : vector<16x1xf32>
    %34 = math.rsqrt %33 : vector<16x1xf32>
    %cst_21 = arith.constant 9.99999993E-9 : f32
    %cst_22 = arith.constant 9.99999993E-9 : f32
    %35 = arith.mulf %cst_21, %cst_22 : f32
    %36 = vector.broadcast %35 : f32 to vector<16x1xf32>
    %37 = arith.maximumf %30, %36 : vector<16x1xf32>
    %38 = math.rsqrt %37 : vector<16x1xf32>
    %39 = arith.mulf %24, %34 : vector<16x1xf32>
    %40 = arith.mulf %39, %38 : vector<16x1xf32>
    %cst_23 = arith.constant 0.000000e+00 : f32
    %41 = vector.broadcast %cst_23 : f32 to vector<16x1xf32>
    %42 = arith.subf %41, %40 : vector<16x1xf32>
    %43 = math.exp %42 : vector<16x1xf32>
    %44 = math.log1p %43 : vector<16x1xf32>
    %cst_24 = arith.constant 0.000000e+00 : f32
    %45 = vector.broadcast %cst_24 : f32 to vector<16x1xf32>
    %46 = arith.subf %45, %44 : vector<16x1xf32>
    %47 = arith.subf %21, %46 : vector<16x1xf32>
    %c16_i32 = arith.constant 16 : i32
    %48 = arith.muli %arg0, %c16_i32 : i32
    %49 = tpu.iota {dimensions = array<i32: 0>} : vector<16x1xi32>
    %50 = vector.broadcast %48 : i32 to vector<16x1xi32>
    %51 = arith.addi %50, %49 : vector<16x1xi32>
    %c16_i32_25 = arith.constant 16 : i32
    %52 = vector.broadcast %c16_i32_25 : i32 to vector<16x1xi32>
    %53 = arith.cmpi slt, %51, %52 : vector<16x1xi32>
    %cst_26 = arith.constant 0.000000e+00 : f32
    %54 = vector.broadcast %cst_26 : f32 to vector<16x1xf32>
    %55 = arith.select %53, %47, %54 : vector<16x1xi1>, vector<16x1xf32>
    %56 = vector.shape_cast %55 : vector<16x1xf32> to vector<1x16x1xf32>
    %cst_27 = arith.constant dense<0.000000e+00> : vector<1xf32>
    %57 = vector.multi_reduction <add>, %56, %cst_27 [1, 2] : vector<1x16x1xf32> to vector<1xf32>
    %58 = vector.shape_cast %57 : vector<1xf32> to vector<1x1x1xf32>
    %59 = vector.extract %58[0, 0, 0] : f32 from vector<1x1x1xf32>
    %c0_28 = arith.constant 0 : index
    %c0_29 = arith.constant 0 : index
    %60 = memref.load %arg8[%c0_28, %c0_29] : memref<1x1xf32, #tpu.memory_space<smem>>
    memref.store %59, %arg8[%c0_28, %c0_29] : memref<1x1xf32, #tpu.memory_space<smem>>
    return
  }
  func.func @transform_0(%arg0: i32) -> (i32, i32) {
    %c0_i32 = arith.constant 0 : i32
    %c0_i32_0 = arith.constant 0 : i32
    return %arg0, %c0_i32 : i32, i32
  }
  func.func @transform_1(%arg0: i32) -> (i32, i32) {
    %c0_i32 = arith.constant 0 : i32
    %c0_i32_0 = arith.constant 0 : i32
    %c0_i32_1 = arith.constant 0 : i32
    return %c0_i32, %c0_i32_0 : i32, i32
  }
  func.func @transform_2(%arg0: i32) -> (i32, i32) {
    %c0_i32 = arith.constant 0 : i32
    %c0_i32_0 = arith.constant 0 : i32
    %c0_i32_1 = arith.constant 0 : i32
    return %c0_i32, %c0_i32_0 : i32, i32
  }
  func.func @transform_3(%arg0: i32) -> (i32, i32) {
    %c0_i32 = arith.constant 0 : i32
    %c0_i32_0 = arith.constant 0 : i32
    %c0_i32_1 = arith.constant 0 : i32
    return %c0_i32, %c0_i32_0 : i32, i32
  }
  func.func @transform_4(%arg0: i32) -> (i32, i32) {
    %c0_i32 = arith.constant 0 : i32
    %c0_i32_0 = arith.constant 0 : i32
    %c0_i32_1 = arith.constant 0 : i32
    return %c0_i32, %c0_i32_0 : i32, i32
  }
  func.func @transform_5(%arg0: i32) -> (i32, i32) {
    %c0_i32 = arith.constant 0 : i32
    %c0_i32_0 = arith.constant 0 : i32
    return %arg0, %c0_i32 : i32, i32
  }
  func.func @transform_6(%arg0: i32) -> (i32, i32) {
    %c0_i32 = arith.constant 0 : i32
    %c0_i32_0 = arith.constant 0 : i32
    return %arg0, %c0_i32 : i32, i32
  }
  func.func @transform_7(%arg0: i32) -> (i32, i32) {
    %c0_i32 = arith.constant 0 : i32
    %c0_i32_0 = arith.constant 0 : i32
    return %arg0, %c0_i32 : i32, i32
  }
}

</mosaic_0001>

<bundles_post_ra>
// kernel: tpu_custom_call.1
= control target key start
LH: loop header
LB: loop body
LE: loop exit
PB: predicated region body
PF: predicated region fallthrough
CT: control target
= control target key end

     0   :  { %13 = vsyncpa [#allocation3], 0  ;;  %v484_v1 = vmov 0.0   ;;  %vm485_vm0 = vmmov 0   ;;  %vm54_vm1 = vcmask 261120   ;;  %s611_s0 = inlined_call_operand.vmem [shape: f32[16,32], index: 0, kind: input, shape index: {}]   ;;  %s612_s1 = inlined_call_operand.vmem [shape: bf16[32,128], index: 1, kind: input, shape index: {}]   ;;  %s613_s2 = inlined_call_operand.vmem [shape: f32[1,128], index: 2, kind: input, shape index: {}]   ;;  %s614_s3 = inlined_call_operand.vmem [shape: bf16[128,32], index: 3, kind: input, shape index: {}]   ;;  %s615_s4 = inlined_call_operand.vmem [shape: f32[1,32], index: 4, kind: input, shape index: {}]   ;;  %s616_s5 = inlined_call_operand.vmem [shape: f32[16,32], index: 5, kind: input, shape index: {}]   ;;  %s617_s6 = inlined_call_operand.hbm [shape: bf16[16,32], index: 6, kind: output, shape index: {0}]   ;;  %s618_s7 = inlined_call_operand.hbm [shape: f32[1,1], index: 7, kind: output, shape index: {1}]  }
   0x1   :  { %v422_v0 = vld [vmem:[%s612_s1] sm:$0xff]   ;;  %386 = vmatprep.subr.bf16.mxu0 %v484_v1  ;;  %v423_v2 = vld [vmem:[%s612_s1 + $0x8] sm:$0xff]   ;;  %394 = vmatprep.subr.bf16.mxu1 %v484_v1  ;;  %v426_v8 = vld [vmem:[%s614_s3 + $0x10] sm:$0xff]  }
   0x2   :  { %387 = vmatpush3.bf16.msra.mxu0 %v422_v0  ;;  %390 = vmatprep.mubr.msk.bf16.mxu0 %vm485_vm0, %v484_v1  ;;  %v28_v3 = vld [vmem:[%s611_s0] sm:$0xff]  ;;  %v29_v4 = vld [vmem:[%s611_s0 + $0x8] sm:$0xff] }
   0x3   :  { %388 = vmatprep.subr.bf16.mxu0 %v484_v1  ;;  %v424_v5 = vld [vmem:[%s614_s3] sm:$0xff]   ;;  %410 = vmatprep.mubr.msk.bf16.mxu1 %vm485_vm0, %v484_v1  ;;  %v30_v6 = vpack.c.bf16 %v29_v4, %v28_v3  ;;  %v425_v7 = vld [vmem:[%s614_s3 + $0x8] sm:$0xff]  }
   0x4   :  { %395 = vmatpush3.bf16.msra.mxu1 %v424_v5 }
   0x5   :  { %396 = vmatprep.subr.bf16.mxu1 %v484_v1 }
   0x6   :  { %389 = vmatpush3.bf16.msra.mxu0 %v423_v2 }
   0x8   :  { %397 = vmatpush3.bf16.msra.mxu1 %v425_v7 }
   0x9   :  { %391 = vmatmul.mubr.msk.bf16.vlgmr.msra.gmra.mrb[0].mxu0 %vm54_vm1, %v30_v6  ;;  %398 = vmatprep.subr.bf16.mxu1 %v484_v1 }
   0xa   :  { %14 = vsyncpa [#allocation4], 0  ;;  %v427_v9 = vld [vmem:[%s614_s3 + $0x18] sm:$0xff]   ;;  %v428_v10 = vld [vmem:[%s614_s3 + $0x20] sm:$0xff]   ;;  %vm220_vm2 = vcmask 257024   ;;  %vm313_vm5 = vcmask 7168  }
   0xb   :  { %v429_v11 = vld [vmem:[%s614_s3 + $0x28] sm:$0xff]   ;;  %v430_v12 = vld [vmem:[%s614_s3 + $0x30] sm:$0xff]   ;;  %v431_v13 = vld [vmem:[%s614_s3 + $0x38] sm:$0xff]  }
   0xc   :  { %399 = vmatpush3.bf16.msra.mxu1 %v426_v8  ;;  %v223_v14 = vld [vmem:[%s616_s5] sm:$0xff]  ;;  %v224_v25 = vld [vmem:[%s616_s5 + $0x8] sm:$0xff] }
   0xd   :  { %400 = vmatprep.subr.bf16.mxu1 %v484_v1  ;;  %v254_v15 = vmul.f32 %v223_v14, %v223_v14  ;;  %v357_v17 = vld [vmem:[%s613_s2] ss:$0 sm:$0xff]  ;;  %v255_v26 = vmul.f32 %v224_v25, %v224_v25  ;;  %s486_s2 = smov [#allocation2]  }
   0xe   :  { %v361_v28 = vld [vmem:[%s615_s4] ss:$0 sm:$0xff]  ;;  %s333_s4 = sshll.u32 %s486_s2, 4  ;;  %s334_s4 = int_to_ptr.vmem [resolvable:$true] %s333_s4 }
   0xf   :  { %v256_v16 = vsel %vm54_vm1, %v254_v15, 0.0  ;;  %v259_v27 = vsel %vm54_vm1, %v255_v26, 0.0  ;;  %s448_s5 = scalar_lea.vmem %s334_s4, 128  ;;  %p453_p1 = scmp.lt.s32.totalorder %s334_s4, %s334_s4 }
  0x10   :  { %401 = vmatpush3.bf16.msra.mxu1 %v427_v9  ;;  %257 = vadd.xlane.f32.xlu1 %v256_v16  ;;  %p449_p0 = scmp.ne.s32.totalorder %s334_s4, %s448_s5  ;;  %p454_p2 = scmp.lt.s32.totalorder %s448_s5, %s448_s5 }
  0x11   :  { %402 = vmatprep.subr.bf16.mxu1 %v484_v1 }
  0x12   :  { %p455_p3 = por %p454_p2, %p453_p1 }
  0x14   :  { %403 = vmatpush3.bf16.msra.mxu1 %v428_v10  ;;  %260 = vadd.xlane.f32.xlu1 %v259_v27  ;;  %p456_p4 = pnand %p455_p3, %p449_p0 }
  0x15   :  { %404 = vmatprep.subr.bf16.mxu1 %v484_v1 }
  0x18   :  { %405 = vmatpush3.bf16.msra.mxu1 %v429_v11 }
  0x19   :  { %406 = vmatprep.subr.bf16.mxu1 %v484_v1 }
  0x1c   :  { %407 = vmatpush3.bf16.msra.mxu1 %v430_v12 }
  0x1d   :  { %408 = vmatprep.subr.bf16.mxu1 %v484_v1 }
  0x20   :  { %409 = vmatpush3.bf16.msra.mxu1 %v431_v13 }
  0x9d   :  { %v258_v51 = vpop.xlane.xlu1 %257 }
  0x9e   :  { %v266_v52 = vmax.f32 %v258_v51, 1e-16 }
  0xa0   :  { %432 = vrsqrt.f32 %v266_v52 }
  0xa1   :  { %v261_v54 = vpop.xlane.xlu1 %260 }
  0xa2   :  { %v267_v56 = vmax.f32 %v261_v54, 1e-16 }
  0xaa   :  { %v433_v59 = vpop.eup %432 }
  0xdc   :  { %v92_v18 = vpop.f32.mrb[0].mxu0 }
  0xdd   :  { %v392_v19 = vpop.f32.mrb[1].mxu0  ;;  %v93_v21 = vadd.f32 %v357_v17, %v92_v18 }
  0xde   :  { %v95_v20 = vpop.f32.mrb[2].mxu0 }
  0xdf   :  { %v96_v22 = vadd.f32 %v357_v17, %v95_v20  ;;  %v393_v23 = vpop.f32.mrb[3].mxu0 }
  0xe1   :  { %v99_v24 = vpack.c.bf16 %v96_v22, %v93_v21 }
  0xe3   :  { %411 = vmatmul.mubr.bf16.vlgmr.msra.gmra.mrb[0].mxu1 %v99_v24 }
 0x1b6   :  { %v205_v29 = vpop.f32.mrb[0].mxu1 }
 0x1b7   :  { %v206_v30 = vadd.f32 %v361_v28, %v205_v29  ;;  %v412_v31 = vpop.f32.mrb[1].mxu1 }
 0x1b8   :  { %v208_v32 = vpop.f32.mrb[2].mxu1 }
 0x1b9   :  { %v209_v33 = vadd.f32 %v361_v28, %v208_v32  ;;  %v413_v34 = vpop.f32.mrb[3].mxu1  ;;  %v246_v35 = vmul.f32 %v206_v30, %v206_v30  ;;  %v372_v36 = vpack.c.bf16 %v206_v30, %v206_v30  ;;  %v238_v45 = vmul.f32 %v223_v14, %v206_v30 }
 0x1ba   :  { %v225_v46 = vsub.f32 %v206_v30, %v223_v14 }
 0x1bb   :  { %v248_v37 = vsel %vm54_vm1, %v246_v35, 0.0  ;;  %v239_v38 = vmul.f32 %v224_v25, %v209_v33  ;;  %v247_v39 = vmul.f32 %v209_v33, %v209_v33  ;;  %v226_v40 = vsub.f32 %v209_v33, %v224_v25  ;;  %221 = vst.msk [vmem:[#allocation2] sm:$0xf] %vm220_vm2, %v372_v36 }
 0x1bc   :  { %249 = vadd.xlane.f32.xlu0 %v248_v37  ;;  %v373_v41 = vpack.c.bf16 %v209_v33, %v209_v33  ;;  %v240_v48 = vsel %vm54_vm1, %v238_v45, 0.0  ;;  %v227_v49 = vand.u32 2147483647, %v225_v46 }
 0x1bd   :  { %v243_v42 = vsel %vm54_vm1, %v239_v38, 0.0  ;;  %v228_v43 = vand.u32 2147483647, %v226_v40  ;;  %v251_v44 = vsel %vm54_vm1, %v247_v39, 0.0 }
 0x1be   :  { %244 = vadd.xlane.f32.xlu1 %v243_v42  ;;  %222 = vst.msk [vmem:[#allocation2 + $0x4] sm:$0xf] %vm220_vm2, %v373_v41  ;;  %v229_v50 = vsel %vm54_vm1, %v227_v49, 0.0 }
 0x1bf   :  { %v232_v47 = vsel %vm54_vm1, %v228_v43, 0.0 }
 0x1c0   :  { %252 = vadd.xlane.f32.xlu0 %v251_v44 }
 0x1c2   :  { %233 = vadd.xlane.f32.xlu1 %v232_v47 }
 0x1c4   :  { %241 = vadd.xlane.f32.xlu0 %v240_v48 }
 0x1c8   :  { %230 = vadd.xlane.f32.xlu0 %v229_v50 }
 0x249   :  { %v250_v53 = vpop.xlane.xlu0 %249 }
 0x24a   :  { %v262_v55 = vmax.f32 %v250_v53, 1e-16 }
 0x24b   :  { %v245_v2 = vpop.xlane.xlu1 %244 }
 0x24c   :  { %434 = vrsqrt.f32 %v262_v55 }
 0x24d   :  { %v253_v57 = vpop.xlane.xlu0 %252  ;;  %436 = vrsqrt.f32 %v267_v56 }
 0x24e   :  { %v263_v58 = vmax.f32 %v253_v57, 1e-16 }
 0x24f   :  { %v234_v28 = vpop.xlane.xlu1 %233 }
 0x250   :  { %438 = vrsqrt.f32 %v263_v58  ;;  %v237_v32 = vmul.f32 0.03125, %v234_v28 }
 0x251   :  { %v242_v61 = vpop.xlane.xlu0 %241 }
 0x255   :  { %v231_v23 = vpop.xlane.xlu0 %230 }
 0x256   :  { %v435_v60 = vpop.eup %434  ;;  %v236_v29 = vmul.f32 0.03125, %v231_v23 }
 0x257   :  { %v270_v62 = vmul.f32 %v435_v60, %v242_v61  ;;  %v437_v63 = vpop.eup %436 }
 0x259   :  { %v272_v0 = vmul.f32 %v433_v59, %v270_v62 }
 0x25a   :  { %v439_v1 = vpop.eup %438 }
 0x25b   :  { %v271_v3 = vmul.f32 %v439_v1, %v245_v2  ;;  %v274_v4 = vsub.f32 0.0, %v272_v0 }
 0x25d   :  { %v273_v5 = vmul.f32 %v437_v63, %v271_v3  ;;  %v276_v6 = vmul.f32 1.442695, %v274_v4 }
 0x25f   :  { %v275_v7 = vsub.f32 0.0, %v273_v5  ;;  %440 = vpow2.f32 %v276_v6 }
 0x261   :  { %v278_v8 = vmul.f32 1.442695, %v275_v7 }
 0x263   :  { %442 = vpow2.f32 %v278_v8 }
 0x269   :  { %v441_v9 = vpop.eup %440 }
 0x26a   :  { %v280_v10 = vadd.f32 1.0, %v441_v9  ;;  %v283_v13 = vmul.f32 -0.5, %v441_v9  ;;  %v286_v16 = vand.u32 2147483647, %v441_v9 }
 0x26c   :  { %444 = vlog2.f32 %v280_v10  ;;  %v284_v15 = vadd.f32 1.0, %v283_v13  ;;  %vm287_vm3 = vcmp.lt.f32.partialorder %v286_v16, 0.0004427343 }
 0x26d   :  { %v443_v11 = vpop.eup %442 }
 0x26e   :  { %v289_v12 = vadd.f32 1.0, %v443_v11  ;;  %v292_v14 = vmul.f32 -0.5, %v443_v11  ;;  %v285_v20 = vmul.f32 %v441_v9, %v284_v15  ;;  %v295_v21 = vand.u32 2147483647, %v443_v11 }
 0x270   :  { %446 = vlog2.f32 %v289_v12  ;;  %v293_v18 = vadd.f32 1.0, %v292_v14  ;;  %vm296_vm4 = vcmp.lt.f32.partialorder %v295_v21, 0.0004427343 }
 0x272   :  { %v294_v27 = vmul.f32 %v443_v11, %v293_v18 }
 0x276   :  { %v445_v17 = vpop.eup %444 }
 0x277   :  { %v282_v19 = vmul.f32 0.6931472, %v445_v17 }
 0x279   :  { %v288_v22 = vsel %vm287_vm3, %v285_v20, %v282_v19 }
 0x27a   :  { %v447_v24 = vpop.eup %446  ;;  %v298_v25 = vsub.f32 0.0, %v288_v22 }
 0x27b   :  { %v291_v26 = vmul.f32 0.6931472, %v447_v24 }
 0x27c   :  { %v300_v33 = vsub.f32 %v236_v29, %v298_v25 }
 0x27d   :  { %v297_v30 = vsel %vm296_vm4, %v294_v27, %v291_v26 }
 0x27e   :  { %v299_v31 = vsub.f32 0.0, %v297_v30  ;;  %v314_v35 = vsel %vm313_vm5, %v300_v33, 0.0 }
 0x280   :  { %v301_v34 = vsub.f32 %v237_v32, %v299_v31 }
 0x282   :  { %v315_v36 = vsel %vm313_vm5, %v301_v34, 0.0 }
 0x283   :  { %v316_v37 = vadd.f32 %v315_v36, %v314_v35 }
 0x285   :  { %317 = vadd.xlane.f32.xlu0 %v316_v37 }
 0x286   :  { %459 = shalt.err (!%p456_p4)
}
 0x287   :  { %s460_s9 = scalar_lea.hbm %s617_s6, 128 }
 0x288   :  { %p461_p5 = scmp.ne.s32.totalorder %s617_s6, %s460_s9  ;;  %p464_p6 = scmp.lt.u32.totalorder %s460_s9, %s617_s6 }
 0x28a   :  { %p466_p7 = pnand %p464_p6, %p461_p5 }
 0x28c   :  { %469 = shalt.err (!%p466_p7)
}
 0x28d   :  { %s487_s13 = smov 64   ;;  %s488_s0 = smov 4  }
 0x28e   :  { %339 = dma.vmem_to_hbm [thread:$0]  %s334_s4, 128, %s617_s6, [#allocation3], %s487_s13, %s487_s13, %s488_s0  }
 0x28f   :  { %s470_s19 = scalar_lea.hbm %s618_s7, 16 }
 0x290   :  { %p471_p8 = scmp.ne.s32.totalorder %s618_s7, %s470_s19  ;;  %p474_p9 = scmp.lt.u32.totalorder %s470_s19, %s618_s7 }
 0x292   :  { %p476_p10 = pnand %p474_p9, %p471_p8 }
 0x312   :  { %v318_v38 = vpop.xlane.xlu0 %317 }
 0x313   :  { %v319_v39 = vrot.slane %v318_v38, 4 }
 0x315   :  { %v320_v40 = vadd.f32 %v319_v39, %v318_v38 }
 0x317   :  { %v321_v41 = vrot.slane %v320_v40, 2 }
 0x319   :  { %v322_v42 = vadd.f32 %v321_v41, %v320_v40 }
 0x31b   :  { %v323_v43 = vrot.slane %v322_v42, 1 }
 0x31d   :  { %v324_v44 = vadd.f32 %v323_v43, %v322_v42 }
 0x31f   :  { %414 = vpush %v324_v44 }
 0x350   :  { %s415_s16 = spop %414 }
 0x351   :  { %327 = sst [smem:[#allocation5]] %s415_s16 }
 0x352   :  { %479 = shalt.err (!%p476_p10)
}
 0x353   :  { %s489_s23 = smov [#allocation5]  }
 0x354   :  { %347 = dma.smem_to_hbm %s489_s23, 16, %s618_s7, [#allocation4]  }
 0x355   :  { %480 = dma.done.wait [#allocation3], 128  }
 0x356   :  { %481 = vsyncadd [#allocation3], 4294967168 }
 0x357   :  { %482 = dma.done.wait [#allocation4], 16  }
 0x358   :  { %483 = vsyncadd [#allocation4], 4294967280 }
 0x359   :  { %354 = sfence }
 0x35a   :  { %355 = vsyncpa [#allocation3], 1 }
 0x35b   :  { %356 = vsyncpa [#allocation4], 1 }

</bundles_post_ra>
